<compile_context>
chip_gen: v6e
topology: v6e:2x2x1
jax: 0.10.0
libtpu: 0.0.40
codegen_flags: <defaults>
</compile_context>

<pallas_src>
import functools
import math

import jax
import jax.numpy as jnp
from jax import lax
from jax.experimental import pallas as pl
from jax.experimental.pallas import tpu as pltpu


# ----------------------------------------------------------------------------
# Pallas kernel: fused boundary-score computation (both sides, Bblk batches)
# ----------------------------------------------------------------------------
def _boundary_kernel(do_softmax, T, D,
                     hidden_ref,     # [Bblk, T, D]   f32
                     wfeat_ref,      # [2D, 2D]       bf16  (conv taps x sides)
                     bfeat_ref,      # [1, 2D]        f32   (conv biases)
                     wbil_ref,       # [D, 2D]        bf16  (bilinear, both sides)
                     lw_ref,         # [1, 2D]        f32   (linear-head weights)
                     mask_ref,       # [2, T, T]      f32   (lb already folded in)
                     out_ref):       # [Bblk, T, 2T]  f32   (left | right)
    bblk = hidden_ref.shape[0]
    n = bblk * T

    h = hidden_ref[...].reshape(n, D)                       # leading-dim merge (cheap)
    # Causal shift within each batch block: h_prev[b, 0] = 0.
    # TODO(synk): TimeConvLayer source unavailable; assuming causal (left) padding.
    rolled = pltpu.roll(h, shift=1, axis=0)
    row = lax.broadcasted_iota(jnp.int32, (n, D), 0)
    h_prev = jnp.where(row % T == 0, 0.0, rolled)           # zero first row per batch

    # bf16 operands for the MXU, f32 accumulation.
    hcat = jnp.concatenate([h_prev, h], axis=-1).astype(jnp.bfloat16)   # [n, 2D]
    h_b = h.astype(jnp.bfloat16)                                        # [n, D]

    # Fused time-conv (both taps, both sides) + bias + ReLU  -> [n, 2D] f32
    feat = jnp.maximum(
        jnp.dot(hcat, wfeat_ref[...], preferred_element_type=jnp.float32)
        + bfeat_ref[...], 0.0)
    # Fused bilinear left operand for both sides; linear-head weight folded in.
    q = (jnp.dot(h_b, wbil_ref[...], preferred_element_type=jnp.float32)
         + lw_ref[...])                                                 # [n, 2D] f32

    feat_b = feat.astype(jnp.bfloat16)
    q_b = q.astype(jnp.bfloat16)

    def one_side(side):
        lo = side * D
        qs = q_b[:, lo:lo + D].reshape(bblk, T, D)
        fs = feat_b[:, lo:lo + D].reshape(bblk, T, D)
        # scores[b, i, j] = (h[b,i] @ Wb + lw) . feat[b, j]  + mask[i, j] + lb
        s = jnp.einsum('bid,bjd->bij', qs, fs,
                       preferred_element_type=jnp.float32) + mask_ref[side]
        if do_softmax:
            m = jnp.max(s, axis=-1, keepdims=True)
            e = jnp.exp(s - m)
            denom = jnp.sum(e, axis=-1, keepdims=True)
            s = e * pl.reciprocal(denom, approx=True)
        return s

    # Single, lane-wider output slab shared by both sides: [Bblk, T, 2T]
    out_ref[...] = jnp.concatenate([one_side(0), one_side(1)], axis=-1)


def boundary_scores_pallas(hidden, params, left_mask, right_mask, do_softmax=False):
    """hidden: [B, T, D] f32 -> (left_scores, right_scores): [B, T, T] f32."""
    B, T, D = hidden.shape

    # <=2 grid steps: amortizes per-step overhead and gives v7x's two
    # TensorCores one "parallel" step each. Batch is padded to a multiple.
    num_steps = min(B, 2)
    bblk = math.ceil(B / num_steps)
    b_pad = bblk * num_steps
    if b_pad != B:
        hidden = jnp.pad(hidden, ((0, b_pad - B), (0, 0), (0, 0)))
    # TODO(synk): for production-scale T (>=1k) add a query-row grid axis so the
    #             per-step [T, 2T] score slab stays within v7x scoped VMEM.

    f32, bf16 = jnp.float32, jnp.bfloat16
    # Stack conv taps (rows) x sides (cols): [[w0_l w0_r]; [w1_l w1_r]] -> [2D, 2D]
    w_feat = jnp.concatenate(
        [jnp.concatenate([params["conv_left_w0"], params["conv_right_w0"]], axis=1),
         jnp.concatenate([params["conv_left_w1"], params["conv_right_w1"]], axis=1)],
        axis=0).astype(bf16)
    b_feat = jnp.concatenate(
        [params["conv_left_b"], params["conv_right_b"]], axis=1).astype(f32)
    w_bil = jnp.concatenate(
        [params["bilinear_left_w"], params["bilinear_right_w"]], axis=1).astype(bf16)
    lw = jnp.concatenate(
        [params["lin_left_w"], params["lin_right_w"]], axis=1).astype(f32)
    # Linear-head biases folded into the additive boundary masks.
    masks = jnp.stack(
        [left_mask + params["lin_left_b"][0, 0],
         right_mask + params["lin_right_b"][0, 0]], axis=0).astype(f32)

    rep2 = lambda shape: pl.BlockSpec(shape, lambda b: (0, 0))
    rep3 = lambda shape: pl.BlockSpec(shape, lambda b: (0, 0, 0))

    kernel = functools.partial(_boundary_kernel, do_softmax, T, D)
    out = pl.pallas_call(
        kernel,
        grid=(num_steps,),
        in_specs=[
            pl.BlockSpec((bblk, T, D), lambda b: (b, 0, 0)),   # hidden
            rep2((2 * D, 2 * D)),                              # fused conv weights
            rep2((1, 2 * D)),                                  # conv biases
            rep2((D, 2 * D)),                                  # fused bilinear weights
            rep2((1, 2 * D)),                                  # linear-head weights
            rep3((2, T, T)),                                   # masks (+ lb)
        ],
        out_specs=pl.BlockSpec((bblk, T, 2 * T), lambda b: (b, 0, 0)),
        out_shape=jax.ShapeDtypeStruct((b_pad, T, 2 * T), f32),
        compiler_params=pltpu.CompilerParams(dimension_semantics=("parallel",)),
    )(hidden.astype(f32), w_feat, b_feat, w_bil, lw, masks)

    out = out[:B]
    return out[:, :, :T], out[:, :, T:]


# ----------------------------------------------------------------------------
# Plain-JAX glue: embeddings, char LSTM encoder, bidirectional LSTM
# TODO(synk): sequential LSTM recurrences kept in plain JAX (lax.scan) — not a
#             good fit for a Pallas grid; only the post-LSTM hot path is a kernel.
# ----------------------------------------------------------------------------
def _lstm_scan(x, w_ih, w_hh, b):
    """x: [N, L, Din] -> outputs [N, L, H]."""
    N, L, _ = x.shape
    H = w_hh.shape[1]

    def step(carry, xt):
        h, c = carry
        gates = xt @ w_ih.T + h @ w_hh.T + b
        i, f, g, o = jnp.split(gates, 4, axis=-1)
        i = jax.nn.sigmoid(i)
        f = jax.nn.sigmoid(f)
        g = jnp.tanh(g)
        o = jax.nn.sigmoid(o)
        c = f * c + i * g
        h = o * jnp.tanh(c)
        return (h, c), h

    h0 = jnp.zeros((N, H), x.dtype)
    c0 = jnp.zeros((N, H), x.dtype)
    _, ys = lax.scan(step, (h0, c0), jnp.swapaxes(x, 0, 1))
    return jnp.swapaxes(ys, 0, 1)


def char_encoder(chars, char_len, p):
    B, T, W = chars.shape
    emb = p["char_emb"][chars.reshape(B * T, W)]                 # [BT, W, Ce]
    ys = _lstm_scan(emb, p["char_Wih"], p["char_Whh"], p["char_b"])
    idx = jnp.clip(char_len.reshape(B * T) - 1, 0, W - 1)
    last = ys[jnp.arange(B * T), idx]                            # [BT, enc]
    return last.reshape(B, T, -1)


def bilstm(x, seq_len, p):
    B, T, _ = x.shape
    t = jnp.arange(T)
    valid = (t[None, :] < seq_len[:, None]).astype(x.dtype)[:, :, None]
    fwd = _lstm_scan(x, p["fw_Wih"], p["fw_Whh"], p["fw_b"])
    # Backward direction over the valid (packed) portion only.
    rev_idx = jnp.clip(seq_len[:, None] - 1 - t[None, :], 0, T - 1)
    x_rev = jnp.take_along_axis(x, rev_idx[:, :, None], axis=1) * valid
    bwd_rev = _lstm_scan(x_rev, p["bw_Wih"], p["bw_Whh"], p["bw_b"])
    bwd = jnp.take_along_axis(bwd_rev, rev_idx[:, :, None], axis=1) * valid
    return jnp.concatenate([fwd, bwd], axis=-1) * valid          # [B, T, hidden]


def make_boundary_masks(T, win):
    i = jnp.arange(T)[:, None]
    j = jnp.arange(T)[None, :]
    left = ((j >= (i - win)) & (j <= i)).astype(jnp.float32)
    right = ((j >= i) & (j <= (i + win)) & (j <= T - 1)).astype(jnp.float32)
    return (1.0 - left) * -9999999.0, (1.0 - right) * -9999999.0


# ----------------------------------------------------------------------------
# Deterministic parameter initialization
# ----------------------------------------------------------------------------
def init_params(key, cfg):
    D = cfg["hidden_dim"]
    Hd = D // 2
    d_in = cfg["word_embedding_dim"] + cfg["pos_embedding_dim"] + cfg["word_encoding_dim"]
    names_shapes = {
        "word_emb": (cfg["n_words"], cfg["word_embedding_dim"]),
        "pos_emb": (cfg["n_pos"], cfg["pos_embedding_dim"]),
        "char_emb": (cfg["n_chars"], cfg["char_embedding_dim"]),
        "char_Wih": (4 * cfg["word_encoding_dim"], cfg["char_embedding_dim"]),
        "char_Whh": (4 * cfg["word_encoding_dim"], cfg["word_encoding_dim"]),
        "char_b": (4 * cfg["word_encoding_dim"],),
        "fw_Wih": (4 * Hd, d_in), "fw_Whh": (4 * Hd, Hd), "fw_b": (4 * Hd,),
        "bw_Wih": (4 * Hd, d_in), "bw_Whh": (4 * Hd, Hd), "bw_b": (4 * Hd,),
        "conv_left_w0": (D, D), "conv_left_w1": (D, D), "conv_left_b": (1, D),
        "conv_right_w0": (D, D), "conv_right_w1": (D, D), "conv_right_b": (1, D),
        "bilinear_left_w": (D, D), "bilinear_right_w": (D, D),
        "lin_left_w": (1, D), "lin_left_b": (1, 1),
        "lin_right_w": (1, D), "lin_right_b": (1, 1),
    }
    params = {}
    keys = jax.random.split(key, len(names_shapes))
    for k, (name, shape) in zip(keys, sorted(names_shapes.items())):
        params[name] = (0.1 * jax.random.normal(k, shape)).astype(jnp.float32)
    return params


def boundary_model_forward(params, cfg, words, poss, seq_len, chars, char_len,
                           do_softmax=False):
    embed_words = params["word_emb"][words]                      # [B, T, We]
    embed_poss = params["pos_emb"][poss]                         # [B, T, Pe]
    embed_chars = char_encoder(chars, char_len, params)          # [B, T, Ce_out]
    concat = jnp.concatenate([embed_words, embed_poss, embed_chars], axis=2)
    hidden = bilstm(concat, seq_len, params)                     # [B, T, hidden_dim]
    # dropout_layer: identity in eval mode
    left_mask, right_mask = make_boundary_masks(cfg["max_seq_len"], cfg["win_size"])
    return boundary_scores_pallas(hidden, params, left_mask, right_mask,
                                  do_softmax=do_softmax)


# ----------------------------------------------------------------------------
if __name__ == "__main__":
    cfg = dict(
        max_seq_len=16, win_size=3, hidden_dim=32,
        word_embedding_dim=8, pos_embedding_dim=4,
        char_embedding_dim=4, word_encoding_dim=4,
        n_words=50, n_pos=10, n_chars=20, max_word_len=6,
    )
    B, T, W = 2, cfg["max_seq_len"], cfg["max_word_len"]

    key = jax.random.PRNGKey(0)
    kp, kw, kpos, kc, kcl = jax.random.split(key, 5)
    params = init_params(kp, cfg)

    words = jax.random.randint(kw, (B, T), 0, cfg["n_words"], dtype=jnp.int32)
    poss = jax.random.randint(kpos, (B, T), 0, cfg["n_pos"], dtype=jnp.int32)
    seq_len = jnp.array([T, 11], dtype=jnp.int32)
    chars = jax.random.randint(kc, (B, T, W), 0, cfg["n_chars"], dtype=jnp.int32)
    char_len = jax.random.randint(kcl, (B, T), 1, W + 1, dtype=jnp.int32)

    left_scores, right_scores = boundary_model_forward(
        params, cfg, words, poss, seq_len, chars, char_len, do_softmax=False)
    jax.block_until_ready((left_scores, right_scores))

    left_sm, right_sm = boundary_model_forward(
        params, cfg, words, poss, seq_len, chars, char_len, do_softmax=True)
    jax.block_until_ready((left_sm, right_sm))

    assert left_scores.shape == (B, T, T) and right_scores.shape == (B, T, T)
    assert left_sm.shape == (B, T, T) and right_sm.shape == (B, T, T)
    print("KERNEL_OK")
</pallas_src>

<mosaic_0001>
module attributes {stable_mosaic.version = 11 : i64} {
  func.func @_boundary_kernel(%arg0: i32, %arg1: memref<1x16x32xf32, #tpu.memory_space<vmem>>, %arg2: memref<64x64xbf16, #tpu.memory_space<vmem>>, %arg3: memref<1x64xf32, #tpu.memory_space<vmem>>, %arg4: memref<32x64xbf16, #tpu.memory_space<vmem>>, %arg5: memref<1x64xf32, #tpu.memory_space<vmem>>, %arg6: memref<2x16x16xf32, #tpu.memory_space<vmem>>, %arg7: memref<1x16x32xf32, #tpu.memory_space<vmem>>) attributes {dimension_semantics = [#tpu.dimension_semantics<parallel>], iteration_bounds = array<i64: 2>, scalar_prefetch = 0 : i64, scratch_operands = 0 : i64, tpu.core_type = #tpu.core_type<tc>, window_params = [{transform_indices = @transform_0, window_bounds = array<i64: 1, 16, 32>}, {pipeline_mode = #tpu.pipeline_mode<synchronous>, transform_indices = @transform_1, window_bounds = array<i64: 64, 64>}, {pipeline_mode = #tpu.pipeline_mode<synchronous>, transform_indices = @transform_2, window_bounds = array<i64: 1, 64>}, {pipeline_mode = #tpu.pipeline_mode<synchronous>, transform_indices = @transform_3, window_bounds = array<i64: 32, 64>}, {pipeline_mode = #tpu.pipeline_mode<synchronous>, transform_indices = @transform_4, window_bounds = array<i64: 1, 64>}, {pipeline_mode = #tpu.pipeline_mode<synchronous>, transform_indices = @transform_5, window_bounds = array<i64: 2, 16, 16>}, {transform_indices = @transform_6, window_bounds = array<i64: 1, 16, 32>}]} {
    %c0 = arith.constant 0 : index
    %c0_0 = arith.constant 0 : index
    %c0_1 = arith.constant 0 : index
    %0 = vector.load %arg1[%c0, %c0_0, %c0_1] : memref<1x16x32xf32, #tpu.memory_space<vmem>>, vector<1x16x32xf32>
    %1 = vector.shape_cast %0 : vector<1x16x32xf32> to vector<16x32xf32>
    %c1_i32 = arith.constant 1 : i32
    %2 = tpu.dynamic_rotate %1 by %c1_i32 dim 0 : vector<16x32xf32>, i32 -> vector<16x32xf32>
    %3 = tpu.iota {dimensions = array<i32: 0>} : vector<16x32xi32>
    %c16_i32 = arith.constant 16 : i32
    %c0_i32 = arith.constant 0 : i32
    %4 = arith.cmpi eq, %c16_i32, %c0_i32 : i32
    %c1_i32_2 = arith.constant 1 : i32
    %5 = arith.select %4, %c1_i32_2, %c16_i32 : i32
    %6 = vector.broadcast %5 : i32 to vector<16x32xi32>
    %7 = arith.remsi %3, %6 : vector<16x32xi32>
    %c0_i32_3 = arith.constant 0 : i32
    %8 = vector.broadcast %c0_i32_3 : i32 to vector<16x32xi32>
    %9 = arith.cmpi ne, %7, %8 : vector<16x32xi32>
    %c0_i32_4 = arith.constant 0 : i32
    %10 = vector.broadcast %c0_i32_4 : i32 to vector<16x32xi32>
    %11 = arith.cmpi slt, %7, %10 : vector<16x32xi32>
    %c0_i32_5 = arith.constant 0 : i32
    %12 = arith.cmpi slt, %5, %c0_i32_5 : i32
    %13 = vector.broadcast %12 : i1 to vector<16x32xi1>
    %14 = vector.broadcast %13 : vector<16x32xi1> to vector<16x32xi1>
    %15 = arith.xori %11, %14 : vector<16x32xi1>
    %16 = arith.andi %15, %9 : vector<16x32xi1>
    %17 = vector.broadcast %5 : i32 to vector<16x32xi32>
    %18 = arith.addi %7, %17 : vector<16x32xi32>
    %19 = arith.select %16, %18, %7 : vector<16x32xi1>, vector<16x32xi32>
    %c0_i32_6 = arith.constant 0 : i32
    %20 = vector.broadcast %c0_i32_6 : i32 to vector<16x32xi32>
    %21 = arith.cmpi eq, %19, %20 : vector<16x32xi32>
    %cst = arith.constant 0.000000e+00 : f32
    %22 = vector.broadcast %cst : f32 to vector<16x32xf32>
    %23 = arith.select %21, %22, %2 : vector<16x32xi1>, vector<16x32xf32>
    %24 = tpu.concatenate %23, %1 in 1 : vector<16x32xf32>, vector<16x32xf32> -> vector<16x64xf32>
    %25 = arith.truncf %24 : vector<16x64xf32> to vector<16x64xbf16>
    %26 = arith.truncf %1 : vector<16x32xf32> to vector<16x32xbf16>
    %c0_7 = arith.constant 0 : index
    %c0_8 = arith.constant 0 : index
    %27 = vector.load %arg2[%c0_7, %c0_8] : memref<64x64xbf16, #tpu.memory_space<vmem>>, vector<64x64xbf16>
    %cst_9 = arith.constant dense<0.000000e+00> : vector<16x64xf32>
    %28 = tpu.matmul %25, %27, %cst_9 {dimension_numbers = #tpu.dot_dimension_numbers<[1], [0], [0], [1], [0, 0, 1, 1], [], []>} : vector<16x64xbf16>, vector<64x64xbf16>, vector<16x64xf32> -> vector<16x64xf32>
    %c0_10 = arith.constant 0 : index
    %c0_11 = arith.constant 0 : index
    %29 = vector.load %arg3[%c0_10, %c0_11] : memref<1x64xf32, #tpu.memory_space<vmem>>, vector<1x64xf32>
    %30 = vector.broadcast %29 : vector<1x64xf32> to vector<16x64xf32>
    %31 = arith.addf %28, %30 : vector<16x64xf32>
    %cst_12 = arith.constant 0.000000e+00 : f32
    %32 = vector.broadcast %cst_12 : f32 to vector<16x64xf32>
    %33 = arith.maximumf %31, %32 : vector<16x64xf32>
    %c0_13 = arith.constant 0 : index
    %c0_14 = arith.constant 0 : index
    %34 = vector.load %arg4[%c0_13, %c0_14] : memref<32x64xbf16, #tpu.memory_space<vmem>>, vector<32x64xbf16>
    %cst_15 = arith.constant dense<0.000000e+00> : vector<16x64xf32>
    %35 = tpu.matmul %26, %34, %cst_15 {dimension_numbers = #tpu.dot_dimension_numbers<[1], [0], [0], [1], [0, 0, 1, 1], [], []>} : vector<16x32xbf16>, vector<32x64xbf16>, vector<16x64xf32> -> vector<16x64xf32>
    %c0_16 = arith.constant 0 : index
    %c0_17 = arith.constant 0 : index
    %36 = vector.load %arg5[%c0_16, %c0_17] : memref<1x64xf32, #tpu.memory_space<vmem>>, vector<1x64xf32>
    %37 = vector.broadcast %36 : vector<1x64xf32> to vector<16x64xf32>
    %38 = arith.addf %35, %37 : vector<16x64xf32>
    %39 = arith.truncf %33 : vector<16x64xf32> to vector<16x64xbf16>
    %40 = arith.truncf %38 : vector<16x64xf32> to vector<16x64xbf16>
    %41 = vector.extract_strided_slice %40 {offsets = [0, 0], sizes = [16, 32], strides = [1, 1]} : vector<16x64xbf16> to vector<16x32xbf16>
    %42 = vector.shape_cast %41 : vector<16x32xbf16> to vector<1x16x32xbf16>
    %43 = vector.extract_strided_slice %39 {offsets = [0, 0], sizes = [16, 32], strides = [1, 1]} : vector<16x64xbf16> to vector<16x32xbf16>
    %44 = vector.shape_cast %43 : vector<16x32xbf16> to vector<1x16x32xbf16>
    "tpu.trace_start"() <{level = 10 : i32, message = "bid,bjd->bij"}> : () -> ()
    %cst_18 = arith.constant dense<0.000000e+00> : vector<1x16x16xf32>
    %45 = tpu.matmul %42, %44, %cst_18 {dimension_numbers = #tpu.dot_dimension_numbers<[2], [2], [1], [1], [0, 0, 0, 1, 1, 1], [0], [0]>} : vector<1x16x32xbf16>, vector<1x16x32xbf16>, vector<1x16x16xf32> -> vector<1x16x16xf32>
    "tpu.trace_stop"() : () -> ()
    %c0_19 = arith.constant 0 : index
    %c0_20 = arith.constant 0 : index
    %c0_21 = arith.constant 0 : index
    %46 = vector.load %arg6[%c0_19, %c0_20, %c0_21] : memref<2x16x16xf32, #tpu.memory_space<vmem>>, vector<1x16x16xf32>
    %47 = vector.shape_cast %46 : vector<1x16x16xf32> to vector<16x16xf32>
    %48 = vector.shape_cast %47 : vector<16x16xf32> to vector<1x16x16xf32>
    %49 = arith.addf %45, %48 : vector<1x16x16xf32>
    %50 = vector.extract_strided_slice %40 {offsets = [0, 32], sizes = [16, 32], strides = [1, 1]} : vector<16x64xbf16> to vector<16x32xbf16>
    %51 = vector.shape_cast %50 : vector<16x32xbf16> to vector<1x16x32xbf16>
    %52 = vector.extract_strided_slice %39 {offsets = [0, 32], sizes = [16, 32], strides = [1, 1]} : vector<16x64xbf16> to vector<16x32xbf16>
    %53 = vector.shape_cast %52 : vector<16x32xbf16> to vector<1x16x32xbf16>
    "tpu.trace_start"() <{level = 10 : i32, message = "bid,bjd->bij"}> : () -> ()
    %cst_22 = arith.constant dense<0.000000e+00> : vector<1x16x16xf32>
    %54 = tpu.matmul %51, %53, %cst_22 {dimension_numbers = #tpu.dot_dimension_numbers<[2], [2], [1], [1], [0, 0, 0, 1, 1, 1], [0], [0]>} : vector<1x16x32xbf16>, vector<1x16x32xbf16>, vector<1x16x16xf32> -> vector<1x16x16xf32>
    "tpu.trace_stop"() : () -> ()
    %c1 = arith.constant 1 : index
    %c0_23 = arith.constant 0 : index
    %c0_24 = arith.constant 0 : index
    %55 = vector.load %arg6[%c1, %c0_23, %c0_24] : memref<2x16x16xf32, #tpu.memory_space<vmem>>, vector<1x16x16xf32>
    %56 = vector.shape_cast %55 : vector<1x16x16xf32> to vector<16x16xf32>
    %57 = vector.shape_cast %56 : vector<16x16xf32> to vector<1x16x16xf32>
    %58 = arith.addf %54, %57 : vector<1x16x16xf32>
    %59 = tpu.concatenate %49, %58 in 2 : vector<1x16x16xf32>, vector<1x16x16xf32> -> vector<1x16x32xf32>
    %c0_25 = arith.constant 0 : index
    %c0_26 = arith.constant 0 : index
    %c0_27 = arith.constant 0 : index
    %60 = vector.load %arg7[%c0_25, %c0_26, %c0_27] : memref<1x16x32xf32, #tpu.memory_space<vmem>>, vector<1x16x32xf32>
    tpu.vector_store %arg7[%c0_25, %c0_26, %c0_27], %59 {strides = array<i32>} : memref<1x16x32xf32, #tpu.memory_space<vmem>>, vector<1x16x32xf32>,
    return
  }
  func.func @transform_0(%arg0: i32) -> (i32, i32, i32) {
    %c0_i32 = arith.constant 0 : i32
    %c0_i32_0 = arith.constant 0 : i32
    %c0_i32_1 = arith.constant 0 : i32
    return %arg0, %c0_i32, %c0_i32_0 : i32, i32, i32
  }
  func.func @transform_1(%arg0: i32) -> (i32, i32) {
    %c0_i32 = arith.constant 0 : i32
    %c0_i32_0 = arith.constant 0 : i32
    %c0_i32_1 = arith.constant 0 : i32
    return %c0_i32, %c0_i32_0 : i32, i32
  }
  func.func @transform_2(%arg0: i32) -> (i32, i32) {
    %c0_i32 = arith.constant 0 : i32
    %c0_i32_0 = arith.constant 0 : i32
    %c0_i32_1 = arith.constant 0 : i32
    return %c0_i32, %c0_i32_0 : i32, i32
  }
  func.func @transform_3(%arg0: i32) -> (i32, i32) {
    %c0_i32 = arith.constant 0 : i32
    %c0_i32_0 = arith.constant 0 : i32
    %c0_i32_1 = arith.constant 0 : i32
    return %c0_i32, %c0_i32_0 : i32, i32
  }
  func.func @transform_4(%arg0: i32) -> (i32, i32) {
    %c0_i32 = arith.constant 0 : i32
    %c0_i32_0 = arith.constant 0 : i32
    %c0_i32_1 = arith.constant 0 : i32
    return %c0_i32, %c0_i32_0 : i32, i32
  }
  func.func @transform_5(%arg0: i32) -> (i32, i32, i32) {
    %c0_i32 = arith.constant 0 : i32
    %c0_i32_0 = arith.constant 0 : i32
    %c0_i32_1 = arith.constant 0 : i32
    %c0_i32_2 = arith.constant 0 : i32
    return %c0_i32, %c0_i32_0, %c0_i32_1 : i32, i32, i32
  }
  func.func @transform_6(%arg0: i32) -> (i32, i32, i32) {
    %c0_i32 = arith.constant 0 : i32
    %c0_i32_0 = arith.constant 0 : i32
    %c0_i32_1 = arith.constant 0 : i32
    return %arg0, %c0_i32, %c0_i32_0 : i32, i32, i32
  }
}

</mosaic_0001>

<bundles_post_ra>
// kernel: tpu_custom_call.1
= control target key start
LH: loop header
LB: loop body
LE: loop exit
PB: predicated region body
PF: predicated region fallthrough
CT: control target
= control target key end

     0   :  { %11 = vsyncpa [#allocation3], 0  ;;  %s1392_s0 = inlined_call_operand.hbm [shape: f32[2,16,32], index: 0, kind: input, shape index: {}]   ;;  %s1393_s1 = inlined_call_operand.hbm [shape: bf16[64,64], index: 1, kind: input, shape index: {}]   ;;  %s1394_s2 = inlined_call_operand.vmem [shape: f32[1,64], index: 2, kind: input, shape index: {}]   ;;  %s1395_s3 = inlined_call_operand.hbm [shape: bf16[32,64], index: 3, kind: input, shape index: {}]   ;;  %s1396_s4 = inlined_call_operand.vmem [shape: f32[1,64], index: 4, kind: input, shape index: {}]   ;;  %s1397_s5 = inlined_call_operand.hbm [shape: f32[2,16,16], index: 5, kind: input, shape index: {}]   ;;  %s1398_s6 = inlined_call_operand.hbm [shape: f32[2,16,32], index: 6, kind: output, shape index: {}]  }
   0x1   :  { %13 = vsyncpa [#allocation3 + $0x1], 0 }
   0x2   :  { %14 = vsyncpa [#allocation6], 0 }
   0x3   :  { %15 = vsyncpa [#allocation9], 0 }
   0x4   :  { %16 = vsyncpa [#allocation4], 0 }
   0x5   :  { %18 = vsyncpa [#allocation4 + $0x1], 0  ;;  %s1163_s21 = smov 0   ;;  %s1165_s22 = smov 0  }
   0x6   :  { %s1167_s23 = smov 0   ;;  %s1169_s24 = smov 0  }
   0x7 LB: > { %s1184_s25 = sadd.s32 4294967295, %s1110_s24   ;;  %s755_s26 = sadd.s32 4294967294, %s1110_s24   ;;  %s1110_s24 = sphi %s1169_s24, %s1426_s24   ;;  %s1106_s23 = sphi %s1167_s23, %s1425_s23   ;;  %s1102_s22 = sphi %s1165_s22, %s1424_s22   ;;  %s1098_s21 = sphi %s1163_s21, %s1423_s21  }
   0x8   : > { %p44_p0 = scmp.ne.s32.totalorder %s1102_s22, %s1098_s21  ;;  %p1399_p1 = scmp.eq.s32.totalorder %s1184_s25, 0 }
   0x9   : > { %p179_p3 = scmp.eq.s32.totalorder %s755_s26, 1  ;;  %p756_p5 = scmp.ge.s32.totalorder %s1110_s24, 1 }
   0xa   : > { %p1193_p4 = por %p1399_p1, %p44_p0  ;;  %p186_p7 = scmp.lt.s32.totalorder %s1110_s24, 3 }
   0xb   : > { %p1198_p6 = por %p179_p3, %p44_p0  ;;  %s1112_s30 = smov [#allocation5]  }
   0xc   : > { %s1405_s27 = scalar_select %p1193_p4, 1, 0 }
   0xd   : > { %s1406_s28 = scalar_select %p1198_p6, 1, 0 }
   0xe   : > { %p1203_p8 = pnand %p756_p5, %p186_p7  ;;  %s198_s7 = sshll.u32 %s1112_s30, 4  ;;  %s199_s7 = int_to_ptr.vmem [resolvable:$true] %s198_s7 }
   0xf   : > { %s1113_s9 = smov [#allocation7]   ;;  %s1114_s11 = smov [#allocation8]  }
  0x10   : > { %s1407_s29 = scalar_select %p1203_p8, 1, 0 }
  0x11   : > { %p849_p9 = pneg %p1203_p8  ;;  %s214_s10 = sshll.u32 %s1113_s9, 4  ;;  %s215_s10 = int_to_ptr.vmem [resolvable:$true] %s214_s10 }
  0x12   : > { %s230_s12 = sshll.u32 %s1114_s11, 4  ;;  %s943_s13 = scalar_lea.vmem %s199_s7, 512  ;;  %s231_s12 = int_to_ptr.vmem [resolvable:$true] %s230_s12 }
  0x13   : > { %p1212_p11 = pnand %p849_p9, %p1399_p1  ;;  %p944_p13 = scmp.ne.s32.totalorder %s199_s7, %s943_s13 }
  0x14   : > { %p951_p5 = scmp.lt.s32.totalorder %s199_s7, %s199_s7  ;;  %p952_p7 = scmp.lt.s32.totalorder %s943_s13, %s943_s13 }
  0x15   : > { %p934_p12 = pneg %p1212_p11 }
  0x16   : > { %p953_p9 = por %p952_p7, %p951_p5 }
  0x17   : > { %p946_p0 = pnand %p944_p13, %p934_p12 }
  0x19   : > { %p947_p3 = pneg %p946_p0 }
  0x1b   : > { %p954_p10 = pnand %p953_p9, %p947_p3 }
  0x1d   : > { %957 = shalt.err (!%p954_p10)
}
  0x1e   : > { %s1115_s14 = smov 64   ;;  %s1116_s15 = smov 4  }
  0x1f   : > { %852 = dma.hbm_to_vmem [thread:$0]  (!%p1212_p11), %s1393_s1, 512, %s199_s7, [#allocation6], %s1115_s14, %s1115_s14, %s1116_s15  }
  0x20   : > { %s969_s18 = scalar_lea.vmem %s215_s10, 256  ;;  %p977_p2 = scmp.lt.s32.totalorder %s215_s10, %s215_s10 }
  0x21   : > { %p970_p1 = scmp.ne.s32.totalorder %s215_s10, %s969_s18  ;;  %p978_p6 = scmp.lt.s32.totalorder %s969_s18, %s969_s18 }
  0x23   : > { %p972_p13 = pnand %p970_p1, %p934_p12  ;;  %p979_p5 = por %p978_p6, %p977_p2 }
  0x25   : > { %p973_p0 = pneg %p972_p13 }
  0x27   : > { %p980_p3 = pnand %p979_p5, %p973_p0 }
  0x29   : > { %983 = shalt.err (!%p980_p3)
}
  0x2a   : > { %855 = dma.hbm_to_vmem [thread:$0]  (!%p1212_p11), %s1395_s3, 256, %s215_s10, [#allocation6], %s1115_s14, %s1115_s14, %s1116_s15  }
  0x2b   : > { %s995_s26 = scalar_lea.vmem %s231_s12, 512  ;;  %p1003_p9 = scmp.lt.s32.totalorder %s231_s12, %s231_s12 }
  0x2c   : > { %p996_p10 = scmp.ne.s32.totalorder %s231_s12, %s995_s26  ;;  %p1004_p13 = scmp.lt.s32.totalorder %s995_s26, %s995_s26 }
  0x2e   : > { %p998_p7 = pnand %p996_p10, %p934_p12  ;;  %p1005_p4 = por %p1004_p13, %p1003_p9 }
  0x30   : > { %p999_p1 = pneg %p998_p7 }
  0x32   : > { %p1006_p2 = pnand %p1005_p4, %p999_p1 }
  0x34   : > { %1009 = shalt.err (!%p1006_p2)
}
  0x35   : > { %s1401_s30 = smov 128   ;;  %s1402_s7 = smov 8  }
  0x36   : > { %858 = dma.hbm_to_vmem [thread:$0]  (!%p1212_p11), %s1397_s5, 512, %s231_s12, [#allocation9], %s1401_s30, %s1401_s30, %s1402_s7  }
  0x37   : > { %s1246_s11 = sadd.s32 1, %s1110_s24   ;;  %s31_s14 = sadd.s32 1, %s1106_s23 }
  0x38   : > { %s28_s13 = ssub.s32 %s1110_s24, %s1246_s11  ;;  %p38_p6 = scmp.ne.s32.totalorder %s1106_s23, %s1102_s22 }
  0x39   : > { %p29_p4 = scmp.eq.s32.totalorder %s28_s13, 0  ;;  %p39_p12 = scmp.eq.s32.totalorder %s1110_s24, 0 }
  0x3a   : > { %p870_p0 = scmp.lt.s32.totalorder %s1110_s24, 2  ;;  %p1409_p3 = scmp.eq.s32.totalorder %s1184_s25, 1 }
  0x3b   : > { %s1256_s15 = scalar_select %p29_p4, %s1106_s23, %s31_s14  }
  0x3c   : > { %p40_p5 = por %p39_p12, %p38_p6  ;;  %p1260_p10 = por %p1409_p3, %p38_p6 }
  0x3d   : > { %s244_s16 = sand.u32 1, %s1106_s23   ;;  %s787_s17 = sshll.u32 %s1110_s24, 8 }
  0x3e   : > { %s1410_s8 = scalar_select %p1260_p10, 1, 0 }
  0x3f   : > { %s761_s12 = sshll.u32 %s244_s16, 4  ;;  %s1269_s20 = scalar_lea.hbm %s1392_s0, %s787_s17 }
  0x40   : > { %s248_s26 = scalar_lea.vmem [#allocation2], %s761_s12  ;;  %p1271_p11 = pnand %p870_p0, %p40_p5 }
  0x41   : > { %s255_s9 = sshll.u32 %s248_s26, 4  ;;  %s1277_s13 = scalar_lea.sflag [#allocation3], %s244_s16  ;;  %s1275_s9 = int_to_ptr.vmem [resolvable:$true] %s255_s9 }
  0x42   : > { %s1010_s14 = scalar_lea.hbm %s1269_s20, 256  ;;  %p1012_p1 = pneg %p1271_p11 }
  0x43   : > { %p1011_p7 = scmp.ne.s32.totalorder %s1269_s20, %s1010_s14  ;;  %s1015_s12 = scalar_lea.hbm %s1392_s0, 512 }
  0x44   : > { %p1016_p2 = scmp.lt.s32.totalorder %s1269_s20, %s1392_s0  ;;  %p1017_p4 = scmp.lt.s32.totalorder %s1015_s12, %s1010_s14 }
  0x45   : > { %p1013_p9 = pnand %p1012_p1, %p1011_p7 }
  0x46   : > { %p1018_p6 = por %p1017_p4, %p1016_p2 }
  0x47   : > { %p1014_p13 = pneg %p1013_p9 }
  0x49   : > { %p1019_p12 = pnand %p1018_p6, %p1014_p13 }
  0x4b   : > { %1022 = shalt.err (!%p1019_p12)
}
  0x4c   : > { %s1023_s16 = scalar_lea.vmem %s1275_s9, 256  ;;  %s1119_s30 = smov [#allocation2]  }
  0x4d   : > { %p1024_p0 = scmp.ne.s32.totalorder %s1275_s9, %s1023_s16  ;;  %s1028_s7 = sshll.u32 %s1119_s30, 4  ;;  %s1029_s7 = int_to_ptr.vmem [resolvable:$false] %s1028_s7 }
  0x4e   : > { %s1030_s17 = scalar_lea.vmem %s1029_s7, 512  ;;  %p1031_p7 = scmp.lt.s32.totalorder %s1275_s9, %s1029_s7 }
  0x4f   : > { %p1026_p5 = pnand %p1024_p0, %p1012_p1  ;;  %p1032_p9 = scmp.lt.s32.totalorder %s1030_s17, %s1023_s16 }
  0x51   : > { %p1027_p3 = pneg %p1026_p5  ;;  %p1033_p10 = por %p1032_p9, %p1031_p7 }
  0x53   : > { %p1034_p8 = pnand %p1033_p10, %p1027_p3 }
  0x55   : > { %1037 = shalt.err (!%p1034_p8)
}
  0x56   : > { %s1412_s14 = smov 8   ;;  %s1413_s18 = smov 128  }
  0x57   : > { %862 = dma.hbm_to_vmem [thread:$0]  (!%p1271_p11), %s1269_s20, 256, %s1275_s9, %s1277_s13, %s1413_s18, %s1413_s18, %s1412_s14  }
  0x58   : > { %p1414_p1 = scmp.ne.s32.totalorder %s1407_s29, 0 }
  0x59   : > { %s1304_s30 = sand.u32 (!%p1414_p1), 1, %s1102_s22   ;;  %p1415_p8 = scmp.ne.s32.totalorder (!%p1414_p1), %s1405_s27, 0 }
  0x5a   : > { %267 = sbr.rel (%p1414_p1) target bundleno = 880 (0x370), region = 44  ;;  %s765_s7 = sshll.u32 (!%p1414_p1), %s1304_s30, 4 }
  0x5b   : > { %s270_s12 = scalar_lea.sflag (!%p1414_p1), [#allocation3], %s1304_s30  ;;  %s273_s10 = scalar_lea.vmem (!%p1414_p1), [#allocation2], %s765_s7 }
  0x5f   : > { %1081 = dma.done.wait (%p1415_p8), %s270_s12, 256  }
  0x60   : > { %1083 = vsyncadd (%p1415_p8), %s270_s12, 4294967040  ;;  %p1416_p10 = scmp.eq.s32.totalorder %s1184_s25, 0 }
  0x62   : > { %1085 = dma.done.wait (%p1416_p10), [#allocation6], 768   ;;  %p1417_p11 = pmov %p1416_p10 }
  0x63   : > { %p1418_p13 = pmov %p1416_p10 }
  0x64   : > { %1087 = vsyncadd (%p1417_p11), [#allocation6], 4294966528 }
  0x65   : > { %1089 = dma.done.wait (%p1418_p13), [#allocation9], 512   ;;  %p1419_p2 = pmov %p1416_p10 }
  0x66   : > { %v319_v0 = vlaneseq  ;;  %v1120_v1 = vmov 0.0   ;;  %vm1121_vm0 = vmmov 0   ;;  %v315_v3 = vld [vmem:[%s273_s10] sm:$0xff]  ;;  %v316_v4 = vld [vmem:[%s273_s10 + $0x8] sm:$0xff]  ;;  %s1122_s27 = smov 32   ;;  %vm361_vm2 = vcmask 261120  }
  0x67   : > { %1091 = vsyncadd (%p1419_p2), [#allocation9], 4294966784  ;;  %801 = vmatprep.subr.bf16.mxu0 %v1120_v1  ;;  %813 = vmatprep.subr.bf16.mxu1 %v1120_v1  ;;  %v318_v5 = vrot.slane %v316_v4, 7  ;;  %v921_v6 = vpack.i.bf16 %v316_v4, %v315_v3  ;;  %v317_v7 = vrot.slane %v315_v3, 7  ;;  %v926_v8 = vld [vmem:[#allocation5 + $0x18] sm:$0xff]   ;;  %v927_v9 = vld [vmem:[#allocation5 + $0x10] sm:$0xff]   ;;  %v365_v15 = vpack.c.bf16 %v316_v4, %v315_v3 }
  0x68   : > { %809 = vmatprep.mubr.msk.bf16.mxu0 %vm1121_vm0, %v1120_v1  ;;  %817 = vmatprep.mubr.msk.bf16.mxu1 %vm1121_vm0, %v1120_v1  ;;  %v320_v2 = vshrl.u32 %v319_v0, 7  ;;  %v930_v12 = vld [vmem:[#allocation7 + $0x8] sm:$0xff]   ;;  %v931_v14 = vld [vmem:[#allocation7] sm:$0xff]   ;;  %vm405_vm4 = vcmask 523264   ;;  %s1123_s9 = smov 96   ;;  %s1124_s26 = smov 16  }
  0x69   : > { %922 = vrot.lane.b32.xlu0 %v921_v6, %s1122_s27  ;;  %802 = vmatpush3.bf16.msra.mxu0 %v926_v8  ;;  %v928_v13 = vld [vmem:[#allocation5 + $0x8] sm:$0xff]   ;;  %v929_v16 = vld [vmem:[#allocation5] sm:$0xff]   ;;  %v521_v59 = vld [vmem:[#allocation8] sm:$0xff]  ;;  %vm634_vm5 = vcmask 130048   ;;  %s313_s16 = scalar_lea.vmem [#allocation10], %s765_s7  ;;  %s788_s14 = sshll.u32 %s1184_s25, 8 }
  0x6a   : > { %vm321_vm1 = vcmp.lt.s32.totalorder %v320_v2, 1  ;;  %803 = vmatprep.subr.bf16.mxu0 %v1120_v1  ;;  %814 = vmatpush3.bf16.msra.mxu1 %v930_v12  ;;  %v329_v17 = vand.u32 15, %v320_v2  ;;  %v776_v25 = vld [vmem:[%s1396_s4] ss:$0 sm:$0xff]  ;;  %v572_v55 = vld [vmem:[#allocation8 + $0x18] sm:$0xff]  ;;  %s653_s17 = sshll.u32 %s313_s16, 4  ;;  %s1348_s10 = scalar_lea.hbm %s1398_s6, %s788_s14  ;;  %s1342_s17 = int_to_ptr.vmem [resolvable:$true] %s653_s17 }
  0x6b   : > { %v322_v10 = vsel %vm321_vm1, %v317_v7, %v318_v5  ;;  %v323_v11 = vsel %vm321_vm1, %v318_v5, %v317_v7  ;;  %815 = vmatprep.subr.bf16.mxu1 %v1120_v1  ;;  %v770_v33 = vld [vmem:[%s1394_s2] ss:$0 sm:$0xff]  ;;  %v522_v61 = vld [vmem:[#allocation8 + $0x8] sm:$0xff]  ;;  %s640_s7 = scalar_lea.sflag [#allocation4], %s1304_s30  ;;  %s1038_s25 = scalar_lea.vmem %s1342_s17, 256 }
  0x6c   : > { %vm349_vm3 = vcmp.eq.s32.totalorder %v329_v17, 0  ;;  %v571_v51 = vld [vmem:[#allocation8 + $0x10] sm:$0xff]  ;;  %p1039_p4 = scmp.ne.s32.totalorder %s1342_s17, %s1038_s25  ;;  %p1420_p6 = scmp.ne.s32.totalorder %s1410_s8, 0 }
  0x6d   : > { %804 = vmatpush3.bf16.msra.mxu0 %v927_v9  ;;  %v351_v19 = vsel %vm349_vm3, 0.0, %v323_v11  ;;  %s1125_s27 = smov [#allocation10]  }
  0x6e   : > { %805 = vmatprep.subr.bf16.mxu0 %v1120_v1  ;;  %816 = vmatpush3.bf16.msra.mxu1 %v931_v14  ;;  %p1040_p12 = pnand %p1039_p4, %p1420_p6  ;;  %s1042_s29 = sshll.u32 %s1125_s27, 4  ;;  %s1043_s29 = int_to_ptr.vmem [resolvable:$false] %s1042_s29 }
  0x6f   : > { %821 = vmatprep.subr.bf16.mxu1 %v1120_v1  ;;  %s1044_s20 = scalar_lea.vmem %s1043_s29, 512  ;;  %p1045_p5 = scmp.lt.s32.totalorder %s1342_s17, %s1043_s29 }
  0x70   : > { %p1041_p0 = pneg %p1040_p12  ;;  %p1046_p3 = scmp.lt.s32.totalorder %s1044_s20, %s1038_s25 }
  0x71   : > { %806 = vmatpush3.bf16.msra.mxu0 %v928_v13  ;;  %818 = vmatmul.mubr.msk.bf16.vlgmr.msra.gmra.mxu1 %vm361_vm2, %v365_v15 }
  0x72   : > { %807 = vmatprep.subr.bf16.mxu0 %v1120_v1  ;;  %823 = vmatprep.mubr.msk.bf16.mxu1 %vm1121_vm0, %v1120_v1  ;;  %p1047_p7 = por %p1046_p3, %p1045_p5 }
  0x74   : > { %p1048_p9 = pnand %p1047_p7, %p1041_p0 }
  0x75   : > { %808 = vmatpush3.bf16.msra.mxu0 %v929_v16 }
  0x76   : > { %827 = vmatprep.subr.bf16.mxu0 %v1120_v1 }
  0xdb   : > { %v923_v18 = vpop.permute.xlu0 %922 }
  0xdc   : > { %v925_v20 = vunpack.i.h.bf16 %v923_v18  ;;  %v924_v21 = vunpack.i.l.bf16 %v923_v18 }
  0xde   : > { %v362_v22 = vsel %vm361_vm2, %v351_v19, %v924_v21  ;;  %v363_v23 = vsel %vm361_vm2, %v322_v10, %v925_v20 }
  0xdf   : > { %v364_v24 = vpack.c.bf16 %v363_v23, %v362_v22 }
  0xe1   : > { %810 = vmatmul.mubr.msk.bf16.vlgmr.msra.gmra.mxu0 %vm405_vm4, %v364_v24 }
  0xe2   : > { %829 = vmatprep.mubr.msk.bf16.mxu0 %vm1121_vm0, %v1120_v1 }
 0x131   : > { %v512_v26 = vpop.f32.mrf.mxu1 }
 0x132   : > { %v513_v28 = vadd.f32 %v776_v25, %v512_v26 }
 0x133   : > { %v819_v27 = vpop.f32.mrf.mxu1 }
 0x135   : > { %v515_v29 = vpop.f32.mrf.mxu1 }
 0x136   : > { %v516_v30 = vadd.f32 %v776_v25, %v515_v29 }
 0x137   : > { %v820_v31 = vpop.f32.mrf.mxu1 }
 0x138   : > { %v520_v32 = vpack.c.bf16 %v516_v30, %v513_v28 }
 0x13a   : > { %574 = vrot.lane.b32.xlu1 %v520_v32, %s1123_s9 }
 0x1a1   : > { %v443_v34 = vpop.f32.mrf.mxu0 }
 0x1a2   : > { %v444_v36 = vadd.f32 %v770_v33, %v443_v34 }
 0x1a3   : > { %v811_v35 = vpop.f32.mrf.mxu0 }
 0x1a4   : > { %v450_v40 = vmax.f32 %v444_v36, 0.0 }
 0x1a5   : > { %v446_v37 = vpop.f32.mrf.mxu0 }
 0x1a6   : > { %v447_v38 = vadd.f32 %v770_v33, %v446_v37 }
 0x1a7   : > { %v812_v39 = vpop.f32.mrf.mxu0 }
 0x1a8   : > { %v451_v41 = vmax.f32 %v447_v38, 0.0 }
 0x1aa   : > { %v519_v42 = vpack.c.bf16 %v451_v41, %v450_v40 }
 0x1ac   : > { %577 = vrot.lane.b32.xlu0 %v519_v42, %s1123_s9  ;;  %v527_v43 = vsel %vm361_vm2, %v519_v42, 0  ;;  %v575_v46 = vpop.permute.xlu1 %574 }
 0x1ad   : > { %822 = vmatpush3.bf16.xpose.msra.mxu1 %v527_v43 }
 0x1b4   : > { %824 = vmatmul.mubr.msk.bf16.vlgmr.msra.gmra.mxu1 %vm361_vm2, %v520_v32 }
 0x21e   : > { %v578_v44 = vpop.permute.xlu0 %577 }
 0x21f   : > { %v583_v45 = vsel %vm361_vm2, %v578_v44, 0 }
 0x220   : > { %828 = vmatpush3.bf16.xpose.msra.mxu0 %v583_v45 }
 0x227   : > { %830 = vmatmul.mubr.msk.bf16.vlgmr.msra.gmra.mxu0 %vm361_vm2, %v575_v46 }
 0x274   : > { %v563_v47 = vpop.f32.mrf.mxu1 }
 0x275   : > { %v564_v60 = vadd.f32 %v563_v47, %v521_v59 }
 0x276   : > { %v825_v48 = vpop.f32.mrf.mxu1 }
 0x278   : > { %v566_v49 = vpop.f32.mrf.mxu1 }
 0x279   : > { %v567_v0 = vadd.f32 %v566_v49, %v522_v61 }
 0x27a   : > { %v826_v50 = vpop.f32.mrf.mxu1 }
 0x2e7   : > { %v619_v52 = vpop.f32.mrf.mxu0 }
 0x2e8   : > { %v620_v53 = vadd.f32 %v619_v52, %v571_v51 }
 0x2e9   : > { %v831_v54 = vpop.f32.mrf.mxu0 }
 0x2ea   : > { %628 = vrot.lane.b32.xlu1 %v620_v53, %s1124_s26 }
 0x2eb   : > { %v622_v56 = vpop.f32.mrf.mxu0 }
 0x2ec   : > { %v623_v57 = vadd.f32 %v622_v56, %v572_v55 }
 0x2ed   : > { %v832_v58 = vpop.f32.mrf.mxu0 }
 0x2ee   : > { %630 = vrot.lane.b32.xlu0 %v623_v57, %s1124_s26 }
 0x35c   : > { %v629_v62 = vpop.permute.xlu1 %628 }
 0x35d   : > { %v635_v63 = vsel %vm634_vm5, %v564_v60, %v629_v62 }
 0x35e   : > { %637 = vst.msk [vmem:[%s313_s16] sm:$0xff] %vm361_vm2, %v635_v63 }
 0x360   : > { %v631_v1 = vpop.permute.xlu0 %630 }
 0x361   : > { %v636_v2 = vsel %vm634_vm5, %v567_v0, %v631_v1 }
 0x362   : > { %638 = vst.msk [vmem:[%s313_s16 + $0x8] sm:$0xff] %vm361_vm2, %v636_v2 }
 0x363   : > { %1051 = shalt.err (!%p1048_p9)
}
 0x364   : > { %s1052_s9 = scalar_lea.hbm %s1348_s10, 256  ;;  %s1056_s26 = scalar_lea.hbm %s1398_s6, 512 }
 0x365   : > { %p1053_p1 = scmp.ne.s32.totalorder %s1348_s10, %s1052_s9  ;;  %p1057_p11 = scmp.lt.s32.totalorder %s1348_s10, %s1398_s6 }
 0x366   : > { %p1058_p13 = scmp.lt.s32.totalorder %s1056_s26, %s1052_s9 }
 0x367   : > { %p1054_p8 = pnand %p1053_p1, %p1420_p6 }
 0x368   : > { %p1059_p2 = por %p1058_p13, %p1057_p11 }
 0x369   : > { %p1055_p10 = pneg %p1054_p8 }
 0x36b   : > { %p1060_p4 = pnand %p1059_p2, %p1055_p10 }
 0x36d   : > { %1063 = shalt.err (!%p1060_p4)
}
 0x36e   : > { %s1126_s18 = smov 128   ;;  %s1127_s12 = smov 8  }
 0x36f   : > { %847 = dma.vmem_to_hbm [thread:$0]  (%p1420_p6), %s1342_s17, 256, %s1348_s10, %s640_s7, %s1126_s18, %s1126_s18, %s1127_s12  }
 0x370 PF: > { %s668_s25 = sand.u32 1, %s1098_s21   ;;  %p1421_p12 = scmp.ne.s32.totalorder %s1406_s28, 0 }
 0x371   : > { %p1422_p0 = scmp.ge.s32.totalorder %s1110_s24, 2  ;;  %s669_s27 = scalar_lea.sflag [#allocation4], %s668_s25 }
 0x373   : > { %p864_p5 = pnand %p1422_p0, %p1421_p12 }
 0x375   : > { %p865_p3 = pneg %p864_p5 }
 0x377   : > { %1093 = dma.done.wait (%p865_p3), %s669_s27, 256  }
 0x378   : > { %1095 = vsyncadd (%p865_p3), %s669_s27, 4294967040  ;;  %p21_p7 = scmp.ge.s32.totalorder %s1246_s11, 4   ;;  %s1423_s21 = smov %s1102_s22 }
 0x379   : > { %s1424_s22 = smov %s1106_s23  ;;  %s1425_s23 = smov %s1256_s15 }
 0x37a   : > { %s1426_s24 = smov %s1246_s11  ;;  %23 = sbr.rel (!%p21_p7) target bundleno = 7 (0x7), region = 102 }
 0x37f   :  { %674 = vsyncpa [#allocation3], 1 }
 0x380   :  { %676 = vsyncpa [#allocation3 + $0x1], 1 }
 0x381   :  { %677 = vsyncpa [#allocation6], 1 }
 0x382   :  { %678 = vsyncpa [#allocation9], 1 }
 0x383   :  { %679 = vsyncpa [#allocation4], 1 }
 0x384   :  { %681 = vsyncpa [#allocation4 + $0x1], 1 }

</bundles_post_ra>
